<compile_context>
chip_gen: v5e
topology: v5e:2x2
jax: 0.10.0
libtpu: 0.0.40
codegen_flags: <defaults>
</compile_context>

<pallas_src>
import jax
import jax.numpy as jnp
from jax.experimental import pallas as pl
from jax.experimental.pallas import tpu as pltpu

NEG_SLOPE = 0.01  # nn.LeakyReLU default negative_slope
SUBLANE = 8       # f32 sublane height


def _round_up(x, m):
    return ((x + m - 1) // m) * m


def _cdiv(a, b):
    return -(-a // b)


def _leaky_relu(x):
    return jnp.where(x > 0, x, NEG_SLOPE * x)


def mlp_kernel(x_ref, w1_ref, b1_ref, w2_ref, b2_ref, w3_ref, b3_ref, o_ref):
    # Cast x to bf16 in-kernel (VPU op hidden under DMA/MXU); wrapper feeds raw f32.
    x = x_ref[...].astype(jnp.bfloat16)
    # Layer 1: Linear (bf16 MXU, f32 acc) + bias/LeakyReLU in f32. Dropout = identity (eval).
    h = jnp.dot(x, w1_ref[...], preferred_element_type=jnp.float32)
    h = _leaky_relu(h + b1_ref[...])
    # Layer 2: Linear + LeakyReLU. Dropout = identity (eval).
    h = jnp.dot(h.astype(jnp.bfloat16), w2_ref[...], preferred_element_type=jnp.float32)
    h = _leaky_relu(h + b2_ref[...])
    # Layer 3: output Linear.
    out = jnp.dot(h.astype(jnp.bfloat16), w3_ref[...], preferred_element_type=jnp.float32)
    o_ref[...] = (out + b3_ref[...]).astype(o_ref.dtype)


def prepare_params(params_true):
    """True-shape params -> kernel params: weights cast to bf16 (MXU operands),
    biases kept f32 (VPU operands).  No zero-padding anywhere."""
    w1, b1, w2, b2, w3, b3 = params_true
    return (w1.astype(jnp.bfloat16), b1.astype(jnp.float32),
            w2.astype(jnp.bfloat16), b2.astype(jnp.float32),
            w3.astype(jnp.bfloat16), b3.astype(jnp.float32))


def _choose_batch_tiling(B, tile_b):
    """Pick (TILE_B, B_pad) with minimal padding waste and >=2 grid steps when
    there is enough work to split (v7x megacore)."""
    n_tiles = max(1, _cdiv(B, tile_b))
    if n_tiles == 1 and B > SUBLANE:
        n_tiles = 2
    tile = _round_up(_cdiv(B, n_tiles), SUBLANE)
    return tile, n_tiles * tile


def mlp_forward(x_nchw, params, *, tile_b=512):
    """x_nchw: (B, C, H, W) float32. Returns (B, output_dim) float32."""
    w1, b1, w2, b2, w3, b3 = params
    B = x_nchw.shape[0]
    x = x_nchw.reshape(B, -1)                      # glue: 'b c h w -> b (c h w)'
    d_in = x.shape[1]
    hid = w1.shape[1]
    out_dim = w3.shape[1]

    TILE_B, B_pad = _choose_batch_tiling(B, tile_b)
    if B_pad != B:
        x = jnp.pad(x, ((0, B_pad - B), (0, 0)))   # small remainder pad only

    grid = (B_pad // TILE_B,)

    # Per-step VMEM footprint: double-buffered x/out tiles + resident weights,
    # plus margin for f32 intermediates / register spills.
    step_bytes = (
        2 * TILE_B * d_in * 4                                   # x tiles (f32)
        + 2 * TILE_B * out_dim * 4                              # out tiles (f32)
        + 2 * (w1.size + w2.size + w3.size) * 2                 # bf16 weights
        + 2 * (b1.size + b2.size + b3.size) * 4                 # f32 biases
        + 4 * TILE_B * max(hid, out_dim) * 4                    # intermediates
    )
    vmem_limit = int(step_bytes * 1.5) + (4 << 20)

    flops = 2 * B_pad * (d_in * hid + hid * hid + hid * out_dim)
    bytes_accessed = (
        B_pad * d_in * 4
        + (w1.size + w2.size + w3.size) * 2
        + (b1.size + b2.size + b3.size) * 4
        + B_pad * out_dim * 4
    )

    out = pl.pallas_call(
        mlp_kernel,
        out_shape=jax.ShapeDtypeStruct((B_pad, out_dim), jnp.float32),
        grid=grid,
        in_specs=[
            pl.BlockSpec((TILE_B, d_in), lambda i: (i, 0)),     # x: tiled over batch
            pl.BlockSpec((d_in, hid), lambda i: (0, 0)),        # w1: resident, true shape
            pl.BlockSpec((1, hid), lambda i: (0, 0)),           # b1: resident
            pl.BlockSpec((hid, hid), lambda i: (0, 0)),         # w2: resident
            pl.BlockSpec((1, hid), lambda i: (0, 0)),           # b2: resident
            pl.BlockSpec((hid, out_dim), lambda i: (0, 0)),     # w3: resident
            pl.BlockSpec((1, out_dim), lambda i: (0, 0)),       # b3: resident
        ],
        out_specs=pl.BlockSpec((TILE_B, out_dim), lambda i: (i, 0)),
        compiler_params=pltpu.CompilerParams(
            dimension_semantics=("parallel",),
            vmem_limit_bytes=vmem_limit,
        ),
        cost_estimate=pl.CostEstimate(
            flops=flops, transcendentals=0, bytes_accessed=bytes_accessed
        ),
    )(x, w1, b1, w2, b2, w3, b3)

    return out[:B] if B_pad != B else out


def init_params(key, input_dim, hidden_dim, output_dim):
    """Deterministic PyTorch-style init: U(-1/sqrt(fan_in), 1/sqrt(fan_in)).
    Weights stored as (in_features, out_features); biases as (1, out_features)."""
    ks = jax.random.split(key, 6)

    def lin(kw, kb, fan_in, fan_out):
        bound = 1.0 / jnp.sqrt(fan_in)
        w = jax.random.uniform(kw, (fan_in, fan_out), jnp.float32, -bound, bound)
        b = jax.random.uniform(kb, (1, fan_out), jnp.float32, -bound, bound)
        return w, b

    w1, b1 = lin(ks[0], ks[1], input_dim, hidden_dim)
    w2, b2 = lin(ks[2], ks[3], hidden_dim, hidden_dim)
    w3, b3 = lin(ks[4], ks[5], hidden_dim, output_dim)
    return (w1, b1, w2, b2, w3, b3)


def ref_forward(x_nchw, params_true):
    """Pure-JAX reference using the same bf16-MXU / f32-accumulate numerics."""
    w1, b1, w2, b2, w3, b3 = params_true
    x = x_nchw.reshape(x_nchw.shape[0], -1)
    h = jnp.dot(x.astype(jnp.bfloat16), w1.astype(jnp.bfloat16),
                preferred_element_type=jnp.float32) + b1
    h = jnp.where(h > 0, h, NEG_SLOPE * h)
    h = jnp.dot(h.astype(jnp.bfloat16), w2.astype(jnp.bfloat16),
                preferred_element_type=jnp.float32) + b2
    h = jnp.where(h > 0, h, NEG_SLOPE * h)
    return jnp.dot(h.astype(jnp.bfloat16), w3.astype(jnp.bfloat16),
                   preferred_element_type=jnp.float32) + b3


if __name__ == "__main__":
    key = jax.random.PRNGKey(0)
    k_x, k_p = jax.random.split(key)

    # Shapes implied by the forward: NCHW input flattened to (B, C*H*W)
    B, C, H, W = 2, 4, 16, 16
    input_dim = C * H * W          # 1024
    hidden_dim = 32
    output_dim = 16

    x = jax.random.normal(k_x, (B, C, H, W), jnp.float32)
    params_true = init_params(k_p, input_dim, hidden_dim, output_dim)
    params = prepare_params(params_true)

    out = mlp_forward(x, params)
    jax.block_until_ready(out)
    ref = ref_forward(x, params_true)
    assert out.shape == (B, output_dim), out.shape
    assert jnp.allclose(out, ref, atol=2e-2, rtol=2e-2), float(
        jnp.max(jnp.abs(out - ref))
    )

    # Also exercise the multi-tile path (grid > 1, remainder batch padding).
    B2 = 300
    x2 = jax.random.normal(k_x, (B2, C, H, W), jnp.float32)
    out2 = mlp_forward(x2, params, tile_b=128)
    jax.block_until_ready(out2)
    ref2 = ref_forward(x2, params_true)
    assert out2.shape == (B2, output_dim), out2.shape
    assert jnp.allclose(out2, ref2, atol=2e-2, rtol=2e-2), float(
        jnp.max(jnp.abs(out2 - ref2))
    )

    print("KERNEL_OK")
</pallas_src>

<mosaic_0001>
module attributes {stable_mosaic.version = 11 : i64} {
  func.func @mlp_kernel(%arg0: i32, %arg1: memref<8x1024xf32, #tpu.memory_space<vmem>>, %arg2: memref<1024x32xbf16, #tpu.memory_space<vmem>>, %arg3: memref<1x32xf32, #tpu.memory_space<vmem>>, %arg4: memref<32x32xbf16, #tpu.memory_space<vmem>>, %arg5: memref<1x32xf32, #tpu.memory_space<vmem>>, %arg6: memref<32x16xbf16, #tpu.memory_space<vmem>>, %arg7: memref<1x16xf32, #tpu.memory_space<vmem>>, %arg8: memref<8x16xf32, #tpu.memory_space<vmem>>) attributes {dimension_semantics = [#tpu.dimension_semantics<parallel>], iteration_bounds = array<i64: 1>, scalar_prefetch = 0 : i64, scratch_operands = 0 : i64, tpu.core_type = #tpu.core_type<tc>, window_params = [{transform_indices = @transform_0, window_bounds = array<i64: 8, 1024>}, {pipeline_mode = #tpu.pipeline_mode<synchronous>, transform_indices = @transform_1, window_bounds = array<i64: 1024, 32>}, {pipeline_mode = #tpu.pipeline_mode<synchronous>, transform_indices = @transform_2, window_bounds = array<i64: 1, 32>}, {pipeline_mode = #tpu.pipeline_mode<synchronous>, transform_indices = @transform_3, window_bounds = array<i64: 32, 32>}, {pipeline_mode = #tpu.pipeline_mode<synchronous>, transform_indices = @transform_4, window_bounds = array<i64: 1, 32>}, {pipeline_mode = #tpu.pipeline_mode<synchronous>, transform_indices = @transform_5, window_bounds = array<i64: 32, 16>}, {pipeline_mode = #tpu.pipeline_mode<synchronous>, transform_indices = @transform_6, window_bounds = array<i64: 1, 16>}, {transform_indices = @transform_7, window_bounds = array<i64: 8, 16>}]} {
    %c0 = arith.constant 0 : index
    %c0_0 = arith.constant 0 : index
    %0 = vector.load %arg1[%c0, %c0_0] : memref<8x1024xf32, #tpu.memory_space<vmem>>, vector<8x1024xf32>
    %1 = arith.truncf %0 : vector<8x1024xf32> to vector<8x1024xbf16>
    %c0_1 = arith.constant 0 : index
    %c0_2 = arith.constant 0 : index
    %2 = vector.load %arg2[%c0_1, %c0_2] : memref<1024x32xbf16, #tpu.memory_space<vmem>>, vector<1024x32xbf16>
    %cst = arith.constant dense<0.000000e+00> : vector<8x32xf32>
    %3 = tpu.matmul %1, %2, %cst {dimension_numbers = #tpu.dot_dimension_numbers<[1], [0], [0], [1], [0, 0, 1, 1], [], []>} : vector<8x1024xbf16>, vector<1024x32xbf16>, vector<8x32xf32> -> vector<8x32xf32>
    %c0_3 = arith.constant 0 : index
    %c0_4 = arith.constant 0 : index
    %4 = vector.load %arg3[%c0_3, %c0_4] : memref<1x32xf32, #tpu.memory_space<vmem>>, vector<1x32xf32>
    %5 = vector.broadcast %4 : vector<1x32xf32> to vector<8x32xf32>
    %6 = arith.addf %3, %5 : vector<8x32xf32>
    %cst_5 = arith.constant 0.000000e+00 : f32
    %7 = vector.broadcast %cst_5 : f32 to vector<8x32xf32>
    %8 = arith.cmpf ogt, %6, %7 : vector<8x32xf32>
    %cst_6 = arith.constant 0.00999999977 : f32
    %9 = vector.broadcast %cst_6 : f32 to vector<8x32xf32>
    %10 = arith.mulf %9, %6 : vector<8x32xf32>
    %11 = arith.select %8, %6, %10 : vector<8x32xi1>, vector<8x32xf32>
    %12 = arith.truncf %11 : vector<8x32xf32> to vector<8x32xbf16>
    %c0_7 = arith.constant 0 : index
    %c0_8 = arith.constant 0 : index
    %13 = vector.load %arg4[%c0_7, %c0_8] : memref<32x32xbf16, #tpu.memory_space<vmem>>, vector<32x32xbf16>
    %cst_9 = arith.constant dense<0.000000e+00> : vector<8x32xf32>
    %14 = tpu.matmul %12, %13, %cst_9 {dimension_numbers = #tpu.dot_dimension_numbers<[1], [0], [0], [1], [0, 0, 1, 1], [], []>} : vector<8x32xbf16>, vector<32x32xbf16>, vector<8x32xf32> -> vector<8x32xf32>
    %c0_10 = arith.constant 0 : index
    %c0_11 = arith.constant 0 : index
    %15 = vector.load %arg5[%c0_10, %c0_11] : memref<1x32xf32, #tpu.memory_space<vmem>>, vector<1x32xf32>
    %16 = vector.broadcast %15 : vector<1x32xf32> to vector<8x32xf32>
    %17 = arith.addf %14, %16 : vector<8x32xf32>
    %cst_12 = arith.constant 0.000000e+00 : f32
    %18 = vector.broadcast %cst_12 : f32 to vector<8x32xf32>
    %19 = arith.cmpf ogt, %17, %18 : vector<8x32xf32>
    %cst_13 = arith.constant 0.00999999977 : f32
    %20 = vector.broadcast %cst_13 : f32 to vector<8x32xf32>
    %21 = arith.mulf %20, %17 : vector<8x32xf32>
    %22 = arith.select %19, %17, %21 : vector<8x32xi1>, vector<8x32xf32>
    %23 = arith.truncf %22 : vector<8x32xf32> to vector<8x32xbf16>
    %c0_14 = arith.constant 0 : index
    %c0_15 = arith.constant 0 : index
    %24 = vector.load %arg6[%c0_14, %c0_15] : memref<32x16xbf16, #tpu.memory_space<vmem>>, vector<32x16xbf16>
    %cst_16 = arith.constant dense<0.000000e+00> : vector<8x16xf32>
    %25 = tpu.matmul %23, %24, %cst_16 {dimension_numbers = #tpu.dot_dimension_numbers<[1], [0], [0], [1], [0, 0, 1, 1], [], []>} : vector<8x32xbf16>, vector<32x16xbf16>, vector<8x16xf32> -> vector<8x16xf32>
    %c0_17 = arith.constant 0 : index
    %c0_18 = arith.constant 0 : index
    %26 = vector.load %arg7[%c0_17, %c0_18] : memref<1x16xf32, #tpu.memory_space<vmem>>, vector<1x16xf32>
    %27 = vector.broadcast %26 : vector<1x16xf32> to vector<8x16xf32>
    %28 = arith.addf %25, %27 : vector<8x16xf32>
    %c0_19 = arith.constant 0 : index
    %c0_20 = arith.constant 0 : index
    %29 = vector.load %arg8[%c0_19, %c0_20] : memref<8x16xf32, #tpu.memory_space<vmem>>, vector<8x16xf32>
    tpu.vector_store %arg8[%c0_19, %c0_20], %28 {strides = array<i32>} : memref<8x16xf32, #tpu.memory_space<vmem>>, vector<8x16xf32>,
    return
  }
  func.func @transform_0(%arg0: i32) -> (i32, i32) {
    %c0_i32 = arith.constant 0 : i32
    %c0_i32_0 = arith.constant 0 : i32
    return %arg0, %c0_i32 : i32, i32
  }
  func.func @transform_1(%arg0: i32) -> (i32, i32) {
    %c0_i32 = arith.constant 0 : i32
    %c0_i32_0 = arith.constant 0 : i32
    %c0_i32_1 = arith.constant 0 : i32
    return %c0_i32, %c0_i32_0 : i32, i32
  }
  func.func @transform_2(%arg0: i32) -> (i32, i32) {
    %c0_i32 = arith.constant 0 : i32
    %c0_i32_0 = arith.constant 0 : i32
    %c0_i32_1 = arith.constant 0 : i32
    return %c0_i32, %c0_i32_0 : i32, i32
  }
  func.func @transform_3(%arg0: i32) -> (i32, i32) {
    %c0_i32 = arith.constant 0 : i32
    %c0_i32_0 = arith.constant 0 : i32
    %c0_i32_1 = arith.constant 0 : i32
    return %c0_i32, %c0_i32_0 : i32, i32
  }
  func.func @transform_4(%arg0: i32) -> (i32, i32) {
    %c0_i32 = arith.constant 0 : i32
    %c0_i32_0 = arith.constant 0 : i32
    %c0_i32_1 = arith.constant 0 : i32
    return %c0_i32, %c0_i32_0 : i32, i32
  }
  func.func @transform_5(%arg0: i32) -> (i32, i32) {
    %c0_i32 = arith.constant 0 : i32
    %c0_i32_0 = arith.constant 0 : i32
    %c0_i32_1 = arith.constant 0 : i32
    return %c0_i32, %c0_i32_0 : i32, i32
  }
  func.func @transform_6(%arg0: i32) -> (i32, i32) {
    %c0_i32 = arith.constant 0 : i32
    %c0_i32_0 = arith.constant 0 : i32
    %c0_i32_1 = arith.constant 0 : i32
    return %c0_i32, %c0_i32_0 : i32, i32
  }
  func.func @transform_7(%arg0: i32) -> (i32, i32) {
    %c0_i32 = arith.constant 0 : i32
    %c0_i32_0 = arith.constant 0 : i32
    return %arg0, %c0_i32 : i32, i32
  }
}

</mosaic_0001>

<bundles_post_ra>
// kernel: tpu_custom_call.1
= control target key start
LH: loop header
LB: loop body
LE: loop exit
PB: predicated region body
PF: predicated region fallthrough
CT: control target
= control target key end

     0   :  { %s1416_s0 = inlined_call_operand.vmem [shape: f32[8,1024], index: 0, kind: input, shape index: {}]   ;;  %s1417_s1 = inlined_call_operand.vmem [shape: bf16[1024,32], index: 1, kind: input, shape index: {}]   ;;  %s1418_s2 = inlined_call_operand.vmem [shape: f32[1,32], index: 2, kind: input, shape index: {}]   ;;  %s1419_s3 = inlined_call_operand.vmem [shape: bf16[32,32], index: 3, kind: input, shape index: {}]   ;;  %s1420_s4 = inlined_call_operand.vmem [shape: f32[1,32], index: 4, kind: input, shape index: {}]   ;;  %s1421_s5 = inlined_call_operand.vmem [shape: bf16[32,16], index: 5, kind: input, shape index: {}]   ;;  %s1422_s6 = inlined_call_operand.vmem [shape: f32[1,16], index: 6, kind: input, shape index: {}]   ;;  %s1423_s7 = inlined_call_operand.hbm [shape: f32[8,16], index: 7, kind: output, shape index: {}]  }
   0x1   :  { %v1044_v0 = vld [vmem:[%s1417_s1 + $0x38] sm:$0xff]  ;;  %v1043_v4 = vld [vmem:[%s1417_s1 + $0x30] sm:$0xff]  ;;  %v1042_v8 = vld [vmem:[%s1417_s1 + $0x28] sm:$0xff] }
   0x2   :  { %v1052_v1 = vld [vmem:[%s1417_s1 + $0x78] sm:$0xff]  ;;  %560 = vmatpush.bf16.msra.mxu0 %v1044_v0  ;;  %v1051_v5 = vld [vmem:[%s1417_s1 + $0x70] sm:$0xff]  ;;  %v1050_v9 = vld [vmem:[%s1417_s1 + $0x68] sm:$0xff] }
   0x3   :  { %v1060_v2 = vld [vmem:[%s1417_s1 + $0xb8] sm:$0xff]  ;;  %573 = vmatpush.bf16.msra.mxu1 %v1052_v1  ;;  %v1059_v6 = vld [vmem:[%s1417_s1 + $0xb0] sm:$0xff]  ;;  %v1058_v10 = vld [vmem:[%s1417_s1 + $0xa8] sm:$0xff] }
   0x4   :  { %v1068_v3 = vld [vmem:[%s1417_s1 + $0xf8] sm:$0xff]  ;;  %586 = vmatpush.bf16.msra.mxu2 %v1060_v2  ;;  %v1067_v7 = vld [vmem:[%s1417_s1 + $0xf0] sm:$0xff]  ;;  %v1066_v11 = vld [vmem:[%s1417_s1 + $0xe8] sm:$0xff] }
   0x5   :  { %599 = vmatpush.bf16.msra.mxu3 %v1068_v3  ;;  %v1041_v12 = vld [vmem:[%s1417_s1 + $0x20] sm:$0xff]  ;;  %v1040_v16 = vld [vmem:[%s1417_s1 + $0x18] sm:$0xff]  ;;  %v1039_v20 = vld [vmem:[%s1417_s1 + $0x10] sm:$0xff] }
   0x6   :  { %561 = vmatpush.bf16.msra.mxu0 %v1043_v4  ;;  %v1049_v13 = vld [vmem:[%s1417_s1 + $0x60] sm:$0xff]  ;;  %v1048_v17 = vld [vmem:[%s1417_s1 + $0x58] sm:$0xff]  ;;  %v1047_v21 = vld [vmem:[%s1417_s1 + $0x50] sm:$0xff] }
   0x7   :  { %574 = vmatpush.bf16.msra.mxu1 %v1051_v5  ;;  %v1057_v14 = vld [vmem:[%s1417_s1 + $0xa0] sm:$0xff]  ;;  %v1056_v18 = vld [vmem:[%s1417_s1 + $0x98] sm:$0xff]  ;;  %v1055_v22 = vld [vmem:[%s1417_s1 + $0x90] sm:$0xff] }
   0x8   :  { %587 = vmatpush.bf16.msra.mxu2 %v1059_v6  ;;  %v1065_v15 = vld [vmem:[%s1417_s1 + $0xe0] sm:$0xff]  ;;  %v1064_v19 = vld [vmem:[%s1417_s1 + $0xd8] sm:$0xff]  ;;  %v1063_v23 = vld [vmem:[%s1417_s1 + $0xd0] sm:$0xff] }
   0x9   :  { %600 = vmatpush.bf16.msra.mxu3 %v1067_v7 }
   0xa   :  { %562 = vmatpush.bf16.msra.mxu0 %v1042_v8 }
   0xb   :  { %575 = vmatpush.bf16.msra.mxu1 %v1050_v9 }
   0xc   :  { %588 = vmatpush.bf16.msra.mxu2 %v1058_v10 }
   0xd   :  { %601 = vmatpush.bf16.msra.mxu3 %v1066_v11 }
   0xe   :  { %563 = vmatpush.bf16.msra.mxu0 %v1041_v12 }
   0xf   :  { %576 = vmatpush.bf16.msra.mxu1 %v1049_v13 }
  0x10   :  { %589 = vmatpush.bf16.msra.mxu2 %v1057_v14 }
  0x11   :  { %602 = vmatpush.bf16.msra.mxu3 %v1065_v15 }
  0x12   :  { %564 = vmatpush.bf16.msra.mxu0 %v1040_v16 }
  0x13   :  { %577 = vmatpush.bf16.msra.mxu1 %v1048_v17 }
  0x14   :  { %590 = vmatpush.bf16.msra.mxu2 %v1056_v18 }
  0x15   :  { %603 = vmatpush.bf16.msra.mxu3 %v1064_v19 }
  0x16   :  { %12 = vsyncpa [#allocation3], 0  ;;  %565 = vmatpush.bf16.msra.mxu0 %v1039_v20  ;;  %v1038_v24 = vld [vmem:[%s1417_s1 + $0x8] sm:$0xff]  ;;  %v1037_v28 = vld [vmem:[%s1417_s1] sm:$0xff]  ;;  %vm688_vm1 = vcmask 261120   ;;  %s1135_s17 = smov [#allocation2]  }
  0x17   :  { %578 = vmatpush.bf16.msra.mxu1 %v1047_v21  ;;  %v1046_v25 = vld [vmem:[%s1417_s1 + $0x48] sm:$0xff]  ;;  %v1045_v29 = vld [vmem:[%s1417_s1 + $0x40] sm:$0xff]  ;;  %v1076_v32 = vld [vmem:[%s1417_s1 + $0x138] sm:$0xff]  ;;  %s752_s18 = sshll.u32 %s1135_s17, 4  ;;  %s754_s20 = sshll.u32 %s1423_s7, 4  ;;  %vm745_vm3 = vcmask 130048   ;;  %s753_s18 = int_to_ptr.vmem [resolvable:$true] %s752_s18  ;;  %s755_s20 = int_to_ptr.hbm [resolvable:$true] %s754_s20 }
  0x18   :  { %591 = vmatpush.bf16.msra.mxu2 %v1055_v22  ;;  %v1054_v26 = vld [vmem:[%s1417_s1 + $0x88] sm:$0xff]  ;;  %v1053_v30 = vld [vmem:[%s1417_s1 + $0x80] sm:$0xff]  ;;  %v30_v33 = vld [vmem:[%s1416_s0 + $0x10] sm:$0xff] }
  0x19   :  { %604 = vmatpush.bf16.msra.mxu3 %v1063_v23  ;;  %v1062_v27 = vld [vmem:[%s1417_s1 + $0xc8] sm:$0xff]  ;;  %v1061_v31 = vld [vmem:[%s1417_s1 + $0xc0] sm:$0xff]  ;;  %v1084_v35 = vld [vmem:[%s1417_s1 + $0x178] sm:$0xff]  ;;  %v38_v40 = vpack.c.bf16 %v30_v33, %v30_v33 }
  0x1a   :  { %566 = vmatpush.bf16.msra.mxu0 %v1038_v24  ;;  %v28_v34 = vld [vmem:[%s1416_s0] sm:$0xff]  ;;  %v31_v36 = vld [vmem:[%s1416_s0 + $0x18] sm:$0xff]  ;;  %v29_v37 = vld [vmem:[%s1416_s0 + $0x8] sm:$0xff] }
  0x1b   :  { %579 = vmatpush.bf16.msra.mxu1 %v1046_v25  ;;  %v1092_v38 = vld [vmem:[%s1417_s1 + $0x1b8] sm:$0xff]  ;;  %v36_v41 = vpack.c.bf16 %v28_v34, %v28_v34  ;;  %v39_v42 = vpack.c.bf16 %v31_v36, %v31_v36  ;;  %v37_v43 = vpack.c.bf16 %v29_v37, %v29_v37  ;;  %v1075_v44 = vld [vmem:[%s1417_s1 + $0x130] sm:$0xff]  ;;  %v1074_v48 = vld [vmem:[%s1417_s1 + $0x128] sm:$0xff] }
  0x1c   :  { %592 = vmatpush.bf16.msra.mxu2 %v1054_v26  ;;  %v1100_v39 = vld [vmem:[%s1417_s1 + $0x1f8] sm:$0xff]  ;;  %v1083_v45 = vld [vmem:[%s1417_s1 + $0x170] sm:$0xff]  ;;  %v1082_v49 = vld [vmem:[%s1417_s1 + $0x168] sm:$0xff] }
  0x1d   :  { %605 = vmatpush.bf16.msra.mxu3 %v1062_v27  ;;  %v1091_v46 = vld [vmem:[%s1417_s1 + $0x1b0] sm:$0xff]  ;;  %v1090_v50 = vld [vmem:[%s1417_s1 + $0x1a8] sm:$0xff]  ;;  %v1073_v52 = vld [vmem:[%s1417_s1 + $0x120] sm:$0xff] }
  0x1e   :  { %567 = vmatpush.bf16.msra.mxu0 %v1037_v28  ;;  %v1099_v47 = vld [vmem:[%s1417_s1 + $0x1f0] sm:$0xff]  ;;  %v1098_v51 = vld [vmem:[%s1417_s1 + $0x1e8] sm:$0xff]  ;;  %v1081_v53 = vld [vmem:[%s1417_s1 + $0x160] sm:$0xff] }
  0x1f   :  { %580 = vmatpush.bf16.msra.mxu1 %v1045_v29  ;;  %v1089_v54 = vld [vmem:[%s1417_s1 + $0x1a0] sm:$0xff]  ;;  %v1072_v56 = vld [vmem:[%s1417_s1 + $0x118] sm:$0xff]  ;;  %v1071_v60 = vld [vmem:[%s1417_s1 + $0x110] sm:$0xff] }
  0x20   :  { %593 = vmatpush.bf16.msra.mxu2 %v1053_v30  ;;  %v1097_v55 = vld [vmem:[%s1417_s1 + $0x1e0] sm:$0xff]  ;;  %v1080_v57 = vld [vmem:[%s1417_s1 + $0x158] sm:$0xff]  ;;  %v1079_v61 = vld [vmem:[%s1417_s1 + $0x150] sm:$0xff] }
  0x21   :  { %606 = vmatpush.bf16.msra.mxu3 %v1061_v31  ;;  %568 = vmatmul.bf16.vlgmr.msra.gmra.mxu0 %v36_v41  ;;  %v1088_v58 = vld [vmem:[%s1417_s1 + $0x198] sm:$0xff]  ;;  %v1087_v62 = vld [vmem:[%s1417_s1 + $0x190] sm:$0xff]  ;;  %v1070_v0 = vld [vmem:[%s1417_s1 + $0x108] sm:$0xff] }
  0x22   :  { %612 = vmatpush.bf16.msrb.mxu0 %v1076_v32  ;;  %581 = vmatmul.bf16.vlgmr.msra.gmra.mxu1 %v37_v43  ;;  %v1096_v59 = vld [vmem:[%s1417_s1 + $0x1d8] sm:$0xff]  ;;  %v1095_v63 = vld [vmem:[%s1417_s1 + $0x1d0] sm:$0xff]  ;;  %v1078_v1 = vld [vmem:[%s1417_s1 + $0x148] sm:$0xff] }
  0x23   :  { %625 = vmatpush.bf16.msrb.mxu1 %v1084_v35  ;;  %594 = vmatmul.bf16.vlgmr.msra.gmra.mxu2 %v38_v40  ;;  %v1086_v2 = vld [vmem:[%s1417_s1 + $0x188] sm:$0xff]  ;;  %v1069_v4 = vld [vmem:[%s1417_s1 + $0x100] sm:$0xff]  ;;  %v34_v10 = vld [vmem:[%s1416_s0 + $0x30] sm:$0xff] }
  0x24   :  { %638 = vmatpush.bf16.msrb.mxu2 %v1092_v38  ;;  %607 = vmatmul.bf16.vlgmr.msra.gmra.mxu3 %v39_v42  ;;  %v1094_v3 = vld [vmem:[%s1417_s1 + $0x1c8] sm:$0xff]  ;;  %v1077_v5 = vld [vmem:[%s1417_s1 + $0x140] sm:$0xff]  ;;  %v35_v11 = vld [vmem:[%s1416_s0 + $0x38] sm:$0xff]  ;;  %v42_v14 = vpack.c.bf16 %v34_v10, %v34_v10 }
  0x25   :  { %651 = vmatpush.bf16.msrb.mxu3 %v1100_v39  ;;  %v1085_v6 = vld [vmem:[%s1417_s1 + $0x180] sm:$0xff]  ;;  %v33_v8 = vld [vmem:[%s1416_s0 + $0x28] sm:$0xff]  ;;  %v43_v15 = vpack.c.bf16 %v35_v11, %v35_v11 }
  0x26   :  { %613 = vmatpush.bf16.msrb.mxu0 %v1075_v44  ;;  %v32_v7 = vld [vmem:[%s1416_s0 + $0x20] sm:$0xff]  ;;  %v41_v13 = vpack.c.bf16 %v33_v8, %v33_v8  ;;  %v1102_v17 = vld [vmem:[%s1419_s3 + $0x8] sm:$0xff] }
  0x27   :  { %626 = vmatpush.bf16.msrb.mxu1 %v1083_v45  ;;  %v1093_v9 = vld [vmem:[%s1417_s1 + $0x1c0] sm:$0xff]  ;;  %v40_v12 = vpack.c.bf16 %v32_v7, %v32_v7  ;;  %v1104_v26 = vld [vmem:[%s1421_s5 + $0x8] sm:$0xff] }
  0x28   :  { %639 = vmatpush.bf16.msrb.mxu2 %v1091_v46  ;;  %v1101_v23 = vld [vmem:[%s1419_s3] sm:$0xff] }
  0x29   :  { %652 = vmatpush.bf16.msrb.mxu3 %v1099_v47  ;;  %v1106_v24 = vld [vmem:[%s1418_s2] ss:$0 sm:$0xff] }
  0x2a   :  { %614 = vmatpush.bf16.msrb.mxu0 %v1074_v48  ;;  %v1103_v47 = vld [vmem:[%s1421_s5] sm:$0xff] }
  0x2b   :  { %627 = vmatpush.bf16.msrb.mxu1 %v1082_v49  ;;  %v1107_v48 = vld [vmem:[%s1420_s4] ss:$0 sm:$0xff] }
  0x2c   :  { %640 = vmatpush.bf16.msrb.mxu2 %v1090_v50 }
  0x2d   :  { %653 = vmatpush.bf16.msrb.mxu3 %v1098_v51 }
  0x2e   :  { %615 = vmatpush.bf16.msrb.mxu0 %v1073_v52 }
  0x2f   :  { %628 = vmatpush.bf16.msrb.mxu1 %v1081_v53 }
  0x30   :  { %641 = vmatpush.bf16.msrb.mxu2 %v1089_v54 }
  0x31   :  { %654 = vmatpush.bf16.msrb.mxu3 %v1097_v55  ;;  %v1108_v55 = vld [vmem:[%s1422_s6] ss:$0 sm:$0xff] }
  0x32   :  { %616 = vmatpush.bf16.msrb.mxu0 %v1072_v56 }
  0x33   :  { %629 = vmatpush.bf16.msrb.mxu1 %v1080_v57 }
  0x34   :  { %642 = vmatpush.bf16.msrb.mxu2 %v1088_v58 }
  0x35   :  { %655 = vmatpush.bf16.msrb.mxu3 %v1096_v59 }
  0x36   :  { %617 = vmatpush.bf16.msrb.mxu0 %v1071_v60 }
  0x37   :  { %630 = vmatpush.bf16.msrb.mxu1 %v1079_v61 }
  0x38   :  { %643 = vmatpush.bf16.msrb.mxu2 %v1087_v62 }
  0x39   :  { %656 = vmatpush.bf16.msrb.mxu3 %v1095_v63 }
  0x3a   :  { %618 = vmatpush.bf16.msrb.mxu0 %v1070_v0 }
  0x3b   :  { %631 = vmatpush.bf16.msrb.mxu1 %v1078_v1 }
  0x3c   :  { %644 = vmatpush.bf16.msrb.mxu2 %v1086_v2 }
  0x3d   :  { %657 = vmatpush.bf16.msrb.mxu3 %v1094_v3 }
  0x3e   :  { %619 = vmatpush.bf16.msrb.mxu0 %v1069_v4 }
  0x3f   :  { %632 = vmatpush.bf16.msrb.mxu1 %v1077_v5 }
  0x40   :  { %645 = vmatpush.bf16.msrb.mxu2 %v1085_v6 }
  0x41   :  { %658 = vmatpush.bf16.msrb.mxu3 %v1093_v9  ;;  %620 = vmatmul.bf16.vlgmr.msrb.gmra.mxu0 %v40_v12 }
  0x42   :  { %633 = vmatmul.bf16.vlgmr.msrb.gmra.mxu1 %v41_v13  ;;  %698 = vmatpush.bf16.msra.mxu0 %v1102_v17 }
  0x43   :  { %646 = vmatmul.bf16.vlgmr.msrb.gmra.mxu2 %v42_v14  ;;  %738 = vmatpush.bf16.msra.mxu1 %v1104_v26 }
  0x44   :  { %659 = vmatmul.bf16.vlgmr.msrb.gmra.mxu3 %v43_v15 }
  0x46   :  { %699 = vmatpush.bf16.msra.mxu0 %v1101_v23 }
  0x47   :  { %739 = vmatpush.bf16.msra.mxu1 %v1103_v47 }
  0x9e   :  { %v569_v16 = vpop.f32.mrf.mxu0 }
  0x9f   :  { %v582_v18 = vpop.f32.mrf.mxu1  ;;  %v570_v28 = vadd.f32 %v1106_v24, %v569_v16 }
  0xa1   :  { %v583_v29 = vadd.f32 %v582_v18, %v570_v28 }
  0xa6   :  { %v595_v19 = vpop.f32.mrf.mxu2  ;;  %v571_v21 = vpop.f32.mrf.mxu0 }
  0xa7   :  { %v608_v20 = vpop.f32.mrf.mxu3  ;;  %v584_v22 = vpop.f32.mrf.mxu1  ;;  %v596_v30 = vadd.f32 %v595_v19, %v583_v29 }
  0xa9   :  { %v609_v31 = vadd.f32 %v608_v20, %v596_v30 }
  0xae   :  { %v597_v25 = vpop.f32.mrf.mxu2 }
  0xaf   :  { %v610_v27 = vpop.f32.mrf.mxu3 }
  0xbe   :  { %v621_v32 = vpop.f32.mrf.mxu0 }
  0xbf   :  { %v634_v33 = vpop.f32.mrf.mxu1  ;;  %v622_v34 = vadd.f32 %v621_v32, %v609_v31 }
  0xc1   :  { %v635_v35 = vadd.f32 %v634_v33, %v622_v34 }
  0xc6   :  { %v647_v36 = vpop.f32.mrf.mxu2  ;;  %v623_v39 = vpop.f32.mrf.mxu0 }
  0xc7   :  { %v660_v37 = vpop.f32.mrf.mxu3  ;;  %v648_v38 = vadd.f32 %v647_v36, %v635_v35  ;;  %v636_v40 = vpop.f32.mrf.mxu1 }
  0xc9   :  { %v661_v41 = vadd.f32 %v660_v37, %v648_v38 }
  0xcb   :  { %vm664_vm0 = vcmp.gt.f32.partialorder %v661_v41, 0.0  ;;  %v665_v42 = vmul.f32 0.01, %v661_v41 }
  0xcd   :  { %v666_v43 = vsel %vm664_vm0, %v661_v41, %v665_v42 }
  0xce   :  { %v667_v44 = vpack.c.bf16 %v666_v43, %v666_v43  ;;  %v649_v45 = vpop.f32.mrf.mxu2 }
  0xcf   :  { %v662_v46 = vpop.f32.mrf.mxu3 }
  0xd0   :  { %1027 = vmatmul.msk.bf16.vlgmr.msra.gmra.mxu0 %vm688_vm1, %v667_v44 }
 0x14d   :  { %v701_v49 = vpop.f32.mrf.mxu0 }
 0x14e   :  { %v702_v50 = vadd.f32 %v1107_v48, %v701_v49 }
 0x150   :  { %vm705_vm2 = vcmp.gt.f32.partialorder %v702_v50, 0.0  ;;  %v706_v51 = vmul.f32 0.01, %v702_v50 }
 0x152   :  { %v707_v52 = vsel %vm705_vm2, %v702_v50, %v706_v51 }
 0x153   :  { %v708_v53 = vpack.c.bf16 %v707_v52, %v707_v52 }
 0x155   :  { %v703_v54 = vpop.f32.mrf.mxu0  ;;  %1036 = vmatmul.msk.bf16.vlgmr.msra.gmra.mxu1 %vm688_vm1, %v708_v53 }
 0x1d2   :  { %v741_v56 = vpop.f32.mrf.mxu1 }
 0x1d3   :  { %v742_v57 = vadd.f32 %v1108_v55, %v741_v56 }
 0x1d5   :  { %746 = vst.msk [vmem:[#allocation2] sm:$0xff] %vm745_vm3, %v742_v57 }
 0x1d6   :  { %757 = dma.vmem_to_hbm [thread:$0]  %s753_s18, 128, %s755_s20, [#allocation3]  }
 0x1da   :  { %v743_v58 = vpop.f32.mrf.mxu1 }
 0x1db   :  { %1133 = dma.done.wait [#allocation3], 128  }
 0x1dc   :  { %1134 = vsyncadd [#allocation3], 4294967168 }
 0x1dd   :  { %762 = vsyncpa [#allocation3], 1 }

</bundles_post_ra>
